<compile_context>
chip_gen: v7x
topology: tpu7x:2x2x1
jax: 0.10.0
libtpu: 0.0.40
codegen_flags: <defaults>
</compile_context>

<pallas_src>
import functools

import jax
import jax.numpy as jnp
from jax import lax
from jax.experimental import pallas as pl
from jax.experimental.pallas import tpu as pltpu


# Mirrors the PyTorch module's self.config (deterministic, in-script).
CONFIG = dict(
    window_size=16,
    max_image_percentage=0.25,
    img_shp=(4, 32, 32),        # (C, H, W); square images required
    reparam_type="beta",
    batch_size=2,
)


def _reparam_map(z, reparam_type):
    # _clamp_sample's clamp_map
    if reparam_type == "beta":
        return z * 2.0 - 1.0
    elif reparam_type == "isotropic_gaussian":
        return (z + 3.0) / 6.0 * 2.0 - 1.0
    raise ValueError(reparam_type)


def _base_coeffs(n, align_corners):
    """x = i * a + b for the normalized sampling coordinate along a size-n axis."""
    if align_corners:
        a = 2.0 / (n - 1) if n > 1 else 0.0
        b = -1.0
    else:                       # pixel centers: (2*i + 1)/n - 1
        a = 2.0 / n
        b = 1.0 / n - 1.0
    return a, b


def _lst_grid_kernel(theta_ref, out_ref, *, H, W, max_scale, reparam_type,
                     align_corners, const_inv):
    """One block of BN samples -> flattened (BN, 2*H*W) sampling grid.

    Lane p of the last dim encodes pixel = p >> 1 (row-major h*W + w) and
    component = p & 1 (0 = x, 1 = y), i.e. exactly the row-major layout of the
    torch-style (H, W, 2) grid, so the wrapper only reshapes (no transpose).
    """
    HW2 = 2 * H * W

    # --- _clamp_sample (vectorized over the whole (BN, 3) tile) -------------
    t = theta_ref[...].astype(jnp.float32)                     # (BN, 3)
    c = jnp.clip(_reparam_map(t, reparam_type), -1.0, 1.0)
    tx = c[:, 1:2]                                             # (BN, 1)
    ty = c[:, 2:3]                                             # (BN, 1)

    # --- z_where_inv scale: max(|s|, clip_scale) -----------------------------
    if const_inv is not None:
        # |s| <= 1 <= max_scale after the clamp -> scale == max_scale always.
        inv = const_inv                                        # python constant
    else:
        s = c[:, 0:1]
        inv = 1.0 / jnp.maximum(jnp.abs(s), max_scale)         # (BN, 1), exact

    # --- expand_z_where + F.affine_grid, interleaved base grid ---------------
    # theta_inv = [[1/sc, 0, -x/sc], [0, 1/sc, -y/sc]]
    #   grid_x = (x_base(w) - x) / sc ; grid_y = (y_base(h) - y) / sc
    p = lax.broadcasted_iota(jnp.int32, (1, HW2), 1)           # lane index
    comp = p & 1                                               # 0 -> x, 1 -> y
    pix = p >> 1                                               # h*W + w
    if W & (W - 1) == 0:                                       # power-of-two W
        col = pix & (W - 1)
        row = pix >> (W.bit_length() - 1)
        col_f = col.astype(jnp.float32)
        row_f = row.astype(jnp.float32)
    else:
        pix_f = pix.astype(jnp.float32)
        row_f = jnp.floor(pix_f / W)
        col_f = pix_f - row_f * W
    ax, bx = _base_coeffs(W, align_corners)
    ay, by = _base_coeffs(H, align_corners)
    x_base = col_f * ax + bx
    y_base = row_f * ay + by
    is_y = comp == 1
    base = jnp.where(is_y, y_base, x_base)                     # (1, HW2)

    # Per-sample offsets broadcast against the lane-parity mask.
    off = jnp.where(is_y, ty, tx)                              # (BN, HW2)

    # Single lane-dense store: 512 lanes = 4 x 128, unmasked full-width vst.
    out_ref[...] = (base - off) * inv


def localized_spatial_transformer_grid(theta, chans=None, config=CONFIG,
                                       block_n=1024, align_corners=False,
                                       xla_batch_threshold=0):
    """JAX/Pallas port of LocalizedSpatialTransformer.forward up to the grid.

    Returns the sampling grid of shape [N, window, window, 2] (what the
    original module hands to the host-side crop pool).

    xla_batch_threshold: batches with N <= threshold use the fused pure-XLA
    path (for module-scale tiny batches the pallas_call launch overhead
    dominates).  Default 0 so the Pallas kernel always runs.
    """
    assert theta.shape[1] == 3, "only operates over 3-feature dims (s, x, y)"
    assert config["img_shp"][1] == config["img_shp"][2], "square imgs only"
    N = theta.shape[0]
    H = W = config["window_size"]
    img_h = config["img_shp"][1]
    max_scale = img_h / (img_h * config["max_image_percentage"])

    if N <= xla_batch_threshold:
        return _reference_grid(theta, config=config, align_corners=align_corners)

    theta = theta.astype(jnp.float32)

    # Block the sample axis: one grid step for small N (block == full array,
    # so no (8,128) padding requirement), otherwise BN-sample blocks with the
    # batch padded up to a multiple of BN (BN is a multiple of 8).  When
    # N > block_n there are always >= 2 blocks, so the "parallel" axis feeds
    # both TensorCores on v7x.
    if N <= block_n:
        BN, Npad = N, N
    else:
        assert block_n % 8 == 0, "block_n must be a multiple of 8"
        BN = block_n
        Npad = int(pl.cdiv(N, BN)) * BN
    if Npad != N:
        theta = jnp.pad(theta, ((0, Npad - N), (0, 0)))
    n_blocks = Npad // BN

    # After the clamp |s| <= 1, so if max_scale >= 1 the scale is constant.
    const_inv = (1.0 / float(max_scale)) if max_scale >= 1.0 else None

    kern = functools.partial(
        _lst_grid_kernel,
        H=H, W=W,
        max_scale=float(max_scale),
        reparam_type=config["reparam_type"],
        align_corners=align_corners,
        const_inv=const_inv,
    )

    # Resident double-buffered VMEM footprint (out tile + lane-padded theta
    # tile); only raise the scoped-VMEM limit when a large block_n needs it
    # (v5e default scoped limit is 16 MiB, v7x is 32 MiB / 64 MiB physical).
    resident_bytes = 2 * (BN * 2 * H * W * 4 + BN * 128 * 4)
    cp_kwargs = dict(dimension_semantics=("parallel",))
    if resident_bytes > (12 << 20):
        cp_kwargs["vmem_limit_bytes"] = min(resident_bytes + (4 << 20), 48 << 20)

    flat = pl.pallas_call(
        kern,
        out_shape=jax.ShapeDtypeStruct((Npad, 2 * H * W), jnp.float32),
        grid_spec=pltpu.PrefetchScalarGridSpec(
            num_scalar_prefetch=0,
            grid=(n_blocks,),
            in_specs=[pl.BlockSpec((BN, 3), lambda i: (i, 0))],
            out_specs=pl.BlockSpec((BN, 2 * H * W), lambda i: (i, 0)),
        ),
        compiler_params=pltpu.CompilerParams(**cp_kwargs),
    )(theta)

    # (Npad, 2*H*W) -> (N, H, W, 2): the kernel already interleaved x/y per
    # lane, so this is a free reshape (no transpose, no extra HBM traffic).
    grid = flat.reshape(Npad, H, W, 2)[:N]

    # TODO(synk): LocalizedSpatialTransformerFn.apply(grid, pool, crop_lambdas)
    # performs host-side ThreadPool "true crops" from external images; no
    # device/Pallas equivalent, so the grid (the module's tensor compute) is
    # returned instead.
    return grid


def _reference_grid(theta, config=CONFIG, align_corners=False):
    """Pure-JAX reference reproducing the PyTorch math (also the tiny-batch path)."""
    c = jnp.clip(_reparam_map(theta.astype(jnp.float32),
                              config["reparam_type"]), -1.0, 1.0)
    s, tx, ty = c[:, 0], c[:, 1], c[:, 2]
    max_scale = config["img_shp"][1] / (
        config["img_shp"][1] * config["max_image_percentage"])
    sc = jnp.maximum(jnp.abs(s), max_scale)
    H = W = config["window_size"]
    ax, bx = _base_coeffs(W, align_corners)
    ay, by = _base_coeffs(H, align_corners)
    xs = jnp.arange(W, dtype=jnp.float32) * ax + bx
    ys = jnp.arange(H, dtype=jnp.float32) * ay + by
    gx = (xs[None, None, :] - tx[:, None, None]) / sc[:, None, None]
    gy = (ys[None, :, None] - ty[:, None, None]) / sc[:, None, None]
    N = theta.shape[0]
    return jnp.stack(
        [jnp.broadcast_to(gx, (N, H, W)), jnp.broadcast_to(gy, (N, H, W))], -1)


if __name__ == "__main__":
    key = jax.random.PRNGKey(0)
    H = W = CONFIG["window_size"]
    chans = CONFIG["img_shp"][0]

    # Primary (module-sized) run: batch_size=2, 'beta' reparam samples in [0,1].
    N = CONFIG["batch_size"]
    theta = jax.random.uniform(key, (N, 3), dtype=jnp.float32)
    grid = jax.block_until_ready(localized_spatial_transformer_grid(theta, chans))
    assert grid.shape == (N, H, W, 2)
    assert jnp.allclose(grid, _reference_grid(theta), atol=1e-5, rtol=1e-5), \
        "mismatch vs reference (small N)"

    # Secondary check: exercise the multi-block + batch-padding path.
    N2 = 20
    theta2 = jax.random.uniform(jax.random.PRNGKey(1), (N2, 3), dtype=jnp.float32)
    grid2 = jax.block_until_ready(
        localized_spatial_transformer_grid(theta2, chans, block_n=8))
    assert grid2.shape == (N2, H, W, 2)
    assert jnp.allclose(grid2, _reference_grid(theta2), atol=1e-5, rtol=1e-5), \
        "mismatch vs reference (blocked N)"

    print("KERNEL_OK")
</pallas_src>

<mosaic_0001>
module attributes {stable_mosaic.version = 11 : i64} {
  func.func @_lst_grid_kernel(%arg0: i32, %arg1: memref<2x3xf32, #tpu.memory_space<vmem>>, %arg2: memref<2x512xf32, #tpu.memory_space<vmem>>) attributes {dimension_semantics = [#tpu.dimension_semantics<parallel>], iteration_bounds = array<i64: 1>, scalar_prefetch = 0 : i64, scratch_operands = 0 : i64, tpu.core_type = #tpu.core_type<tc>, window_params = [{transform_indices = @transform_0, window_bounds = array<i64: 2, 3>}, {transform_indices = @transform_1, window_bounds = array<i64: 2, 512>}]} {
    %c0 = arith.constant 0 : index
    %c0_0 = arith.constant 0 : index
    %0 = vector.load %arg1[%c0, %c0_0] : memref<2x3xf32, #tpu.memory_space<vmem>>, vector<2x3xf32>
    %cst = arith.constant 2.000000e+00 : f32
    %1 = vector.broadcast %cst : f32 to vector<2x3xf32>
    %2 = arith.mulf %0, %1 : vector<2x3xf32>
    %cst_1 = arith.constant 1.000000e+00 : f32
    %3 = vector.broadcast %cst_1 : f32 to vector<2x3xf32>
    %4 = arith.subf %2, %3 : vector<2x3xf32>
    %cst_2 = arith.constant -1.000000e+00 : f32
    %cst_3 = arith.constant 1.000000e+00 : f32
    %5 = vector.broadcast %cst_2 : f32 to vector<2x3xf32>
    %6 = arith.maximumf %5, %4 : vector<2x3xf32>
    %7 = vector.broadcast %cst_3 : f32 to vector<2x3xf32>
    %8 = arith.minimumf %7, %6 : vector<2x3xf32>
    %9 = vector.extract_strided_slice %8 {offsets = [0, 1], sizes = [2, 1], strides = [1, 1]} : vector<2x3xf32> to vector<2x1xf32>
    %10 = vector.extract_strided_slice %8 {offsets = [0, 2], sizes = [2, 1], strides = [1, 1]} : vector<2x3xf32> to vector<2x1xf32>
    %11 = tpu.iota {dimensions = array<i32: 1>} : vector<1x512xi32>
    %c1_i32 = arith.constant 1 : i32
    %12 = vector.broadcast %c1_i32 : i32 to vector<1x512xi32>
    %13 = arith.andi %11, %12 : vector<1x512xi32>
    %c1_i32_4 = arith.constant 1 : i32
    %14 = vector.broadcast %c1_i32_4 : i32 to vector<1x512xi32>
    %15 = arith.shrsi %11, %14 : vector<1x512xi32>
    %c15_i32 = arith.constant 15 : i32
    %16 = vector.broadcast %c15_i32 : i32 to vector<1x512xi32>
    %17 = arith.andi %15, %16 : vector<1x512xi32>
    %c4_i32 = arith.constant 4 : i32
    %18 = vector.broadcast %c4_i32 : i32 to vector<1x512xi32>
    %19 = arith.shrsi %15, %18 : vector<1x512xi32>
    %20 = arith.sitofp %17 : vector<1x512xi32> to vector<1x512xf32>
    %21 = arith.sitofp %19 : vector<1x512xi32> to vector<1x512xf32>
    %cst_5 = arith.constant 1.250000e-01 : f32
    %22 = vector.broadcast %cst_5 : f32 to vector<1x512xf32>
    %23 = arith.mulf %20, %22 : vector<1x512xf32>
    %cst_6 = arith.constant -9.375000e-01 : f32
    %24 = vector.broadcast %cst_6 : f32 to vector<1x512xf32>
    %25 = arith.addf %23, %24 : vector<1x512xf32>
    %cst_7 = arith.constant 1.250000e-01 : f32
    %26 = vector.broadcast %cst_7 : f32 to vector<1x512xf32>
    %27 = arith.mulf %21, %26 : vector<1x512xf32>
    %cst_8 = arith.constant -9.375000e-01 : f32
    %28 = vector.broadcast %cst_8 : f32 to vector<1x512xf32>
    %29 = arith.addf %27, %28 : vector<1x512xf32>
    %c1_i32_9 = arith.constant 1 : i32
    %30 = vector.broadcast %c1_i32_9 : i32 to vector<1x512xi32>
    %31 = arith.cmpi eq, %13, %30 : vector<1x512xi32>
    %32 = arith.select %31, %29, %25 : vector<1x512xi1>, vector<1x512xf32>
    %33 = vector.shape_cast %31 : vector<1x512xi1> to vector<1x512xi1>
    %34 = vector.broadcast %33 : vector<1x512xi1> to vector<2x512xi1>
    %35 = vector.shape_cast %10 : vector<2x1xf32> to vector<2x1xf32>
    %36 = vector.broadcast %35 : vector<2x1xf32> to vector<2x512xf32>
    %37 = vector.shape_cast %9 : vector<2x1xf32> to vector<2x1xf32>
    %38 = vector.broadcast %37 : vector<2x1xf32> to vector<2x512xf32>
    %39 = arith.select %34, %36, %38 : vector<2x512xi1>, vector<2x512xf32>
    %40 = vector.broadcast %32 : vector<1x512xf32> to vector<2x512xf32>
    %41 = arith.subf %40, %39 : vector<2x512xf32>
    %cst_10 = arith.constant 2.500000e-01 : f32
    %42 = vector.broadcast %cst_10 : f32 to vector<2x512xf32>
    %43 = arith.mulf %41, %42 : vector<2x512xf32>
    %c0_11 = arith.constant 0 : index
    %c0_12 = arith.constant 0 : index
    %44 = vector.load %arg2[%c0_11, %c0_12] : memref<2x512xf32, #tpu.memory_space<vmem>>, vector<2x512xf32>
    tpu.vector_store %arg2[%c0_11, %c0_12], %43 {strides = array<i32>} : memref<2x512xf32, #tpu.memory_space<vmem>>, vector<2x512xf32>,
    return
  }
  func.func @transform_0(%arg0: i32) -> (i32, i32) {
    %c0_i32 = arith.constant 0 : i32
    %c0_i32_0 = arith.constant 0 : i32
    return %arg0, %c0_i32 : i32, i32
  }
  func.func @transform_1(%arg0: i32) -> (i32, i32) {
    %c0_i32 = arith.constant 0 : i32
    %c0_i32_0 = arith.constant 0 : i32
    return %arg0, %c0_i32 : i32, i32
  }
}

</mosaic_0001>

<bundles_post_ra>
// kernel: tpu_custom_call.1
= control target key start
LH: loop header
LB: loop body
LE: loop exit
PB: predicated region body
PF: predicated region fallthrough
CT: control target
= control target key end

     0   :  { %6 = vsyncpa [#allocation3], 0  ;;  %s258_s0 = inlined_call_operand.hbm [shape: f32[2,3], index: 0, kind: input, shape index: {}]   ;;  %s259_s1 = inlined_call_operand.hbm [shape: f32[2,512], index: 1, kind: output, shape index: {}]  }
   0x1   :  { %7 = vsyncpa [#allocation4], 0  ;;  %s203_s6 = smov [#allocation2]   ;;  %s155_s10 = scalar_lea.hbm %s258_s0, 32 }
   0x2   :  { %s14_s7 = sshll.u32 %s203_s6, 4  ;;  %p156_p0 = scmp.ne.s32.totalorder %s258_s0, %s155_s10  ;;  %s15_s7 = int_to_ptr.vmem [resolvable:$true] %s14_s7 }
   0x3   :  { %p159_p1 = scmp.lt.u32.totalorder %s155_s10, %s258_s0 }
   0x5   :  { %p161_p2 = pnand %p159_p1, %p156_p0 }
   0x7   :  { %164 = shalt.err (!%p161_p2)
}
   0x8   :  { %s165_s15 = scalar_lea.vmem %s15_s7, 32  ;;  %p170_p4 = scmp.lt.s32.totalorder %s15_s7, %s15_s7 }
   0x9   :  { %p166_p3 = scmp.ne.s32.totalorder %s15_s7, %s165_s15  ;;  %p171_p5 = scmp.lt.s32.totalorder %s165_s15, %s165_s15 }
   0xb   :  { %p172_p6 = por %p171_p5, %p170_p4 }
   0xd   :  { %p173_p7 = pnand %p172_p6, %p166_p3 }
   0xf   :  { %176 = shalt.err (!%p173_p7)
}
  0x10   :  { %17 = dma.hbm_to_vmem [thread:$0]  %s258_s0, 32, %s15_s7, [#allocation3]  }
  0x11   :  { %199 = dma.done.wait [#allocation3], 32  }
  0x12   :  { %200 = vsyncadd [#allocation3], 4294967264  ;;  %v204_v0 = vmov 2   ;;  %v21_v1 = vld [vmem:[#allocation2] sm:$0x3]  ;;  %v205_v5 = vmov 1   ;;  %v26_v6 = vlaneseq }
  0x13   :  { %153 = vset.pattern.permute.xlu0 %v204_v0  ;;  %v22_v2 = vmul.f32 2.0, %v21_v1  ;;  %v206_v54 = vmov 1983009808   ;;  %s207_s0 = smov [#allocation5]  }
  0x14   :  { %v27_v7 = vand.u32 127, %v26_v6  ;;  %v115_v55 = vunpack.c.l.s4 %v206_v54  ;;  %v118_v61 = vshrl.u32 %v26_v6, 7  ;;  %s137_s18 = sshll.u32 %s207_s0, 4  ;;  %s138_s18 = int_to_ptr.vmem [resolvable:$true] %s137_s18 }
  0x15   :  { %v146_v3 = vadd.f32 -1.0, %v22_v2  ;;  %s177_s19 = scalar_lea.vmem %s138_s18, 128  ;;  %p182_p9 = scmp.lt.s32.totalorder %s138_s18, %s138_s18 }
  0x16   :  { %v28_v8 = vadd.s32 128, %v27_v7  ;;  %v29_v9 = vadd.s32 256, %v27_v7  ;;  %v30_v10 = vadd.s32 384, %v27_v7  ;;  %v35_v11 = vshra.s32 %v27_v7, 1  ;;  %p178_p8 = scmp.ne.s32.totalorder %s138_s18, %s177_s19  ;;  %p183_p10 = scmp.lt.s32.totalorder %s177_s19, %s177_s19 }
  0x17   :  { %v147_v4 = vclamps-f32 %v146_v3, 1.0  ;;  %v31_v38 = vand.u32 1, %v27_v7  ;;  %v116_v60 = vunpack.c.0.s8 %v115_v55 }
  0x18   :  { %v36_v12 = vshra.s32 %v28_v8, 1  ;;  %v37_v13 = vshra.s32 %v29_v9, 1  ;;  %v38_v14 = vshra.s32 %v30_v10, 1  ;;  %v39_v15 = vand.u32 15, %v35_v11  ;;  %p184_p11 = por %p183_p10, %p182_p9 }
  0x19   :  { %89 = vperm.xlu0 %153, %v147_v4   ;;  %v43_v19 = vshra.s32 %v35_v11, 4  ;;  %v32_v39 = vand.u32 1, %v28_v8  ;;  %v33_v41 = vand.u32 1, %v29_v9  ;;  %v34_v42 = vand.u32 1, %v30_v10 }
  0x1a   :  { %v40_v16 = vand.u32 15, %v36_v12  ;;  %v41_v17 = vand.u32 15, %v37_v13  ;;  %v42_v18 = vand.u32 15, %v38_v14  ;;  %v44_v20 = vshra.s32 %v36_v12, 4  ;;  %p185_p12 = pnand %p184_p11, %p178_p8 }
  0x1b   :  { %v45_v21 = vshra.s32 %v37_v13, 4  ;;  %v46_v22 = vshra.s32 %v38_v14, 4  ;;  %v47_v23 = vcvt.s32.f32 %v39_v15  ;;  %v51_v27 = vcvt.s32.f32 %v43_v19 }
  0x1c   :  { %v48_v24 = vcvt.s32.f32 %v40_v16  ;;  %v49_v25 = vcvt.s32.f32 %v41_v17  ;;  %v50_v26 = vcvt.s32.f32 %v42_v18  ;;  %v52_v28 = vcvt.s32.f32 %v44_v20 }
  0x1d   :  { %154 = vset.pattern.permute.xlu0 %v205_v5  ;;  %v53_v29 = vcvt.s32.f32 %v45_v21  ;;  %v54_v30 = vcvt.s32.f32 %v46_v22  ;;  %v55_v31 = vmul.f32 0.125, %v47_v23  ;;  %v63_v35 = vmul.f32 0.125, %v51_v27 }
  0x1e   :  { %93 = vperm.xlu0 %154, %v147_v4   ;;  %v56_v32 = vmul.f32 0.125, %v48_v24  ;;  %v57_v33 = vmul.f32 0.125, %v49_v25  ;;  %v58_v34 = vmul.f32 0.125, %v50_v26  ;;  %v64_v36 = vmul.f32 0.125, %v52_v28 }
  0x1f   :  { %v65_v37 = vmul.f32 0.125, %v53_v29  ;;  %v66_v40 = vmul.f32 0.125, %v54_v30  ;;  %v59_v43 = vadd.f32 -0.9375, %v55_v31  ;;  %v67_v47 = vadd.f32 -0.9375, %v63_v35 }
  0x20   :  { %v60_v44 = vadd.f32 -0.9375, %v56_v32  ;;  %v61_v45 = vadd.f32 -0.9375, %v57_v33  ;;  %v62_v46 = vadd.f32 -0.9375, %v58_v34  ;;  %v68_v48 = vadd.f32 -0.9375, %v64_v36 }
  0x21   :  { %v69_v49 = vadd.f32 -0.9375, %v65_v37  ;;  %v70_v51 = vadd.f32 -0.9375, %v66_v40  ;;  %vm230_vm0 = vcmp.eq.s32.totalorder %v31_v38, 1  ;;  %vm234_vm1 = vcmp.eq.s32.totalorder %v32_v39, 1 }
  0x22   :  { %vm73_vm2 = vcmp.eq.s32.totalorder %v33_v41, 1  ;;  %vm74_vm3 = vcmp.eq.s32.totalorder %v34_v42, 1  ;;  %v75_v56 = vsel %vm230_vm0, %v67_v47, %v59_v43  ;;  %v76_v57 = vsel %vm234_vm1, %v68_v48, %v60_v44 }
  0x23   :  { %v77_v58 = vsel %vm73_vm2, %v69_v49, %v61_v45  ;;  %v78_v59 = vsel %vm74_vm3, %v70_v51, %v62_v46  ;;  %v119_v8 = vsub.s32 %v116_v60, %v118_v61 }
  0x98   :  { %v90_v50 = vpop.permute.xlu0 %89 }
  0x9d   :  { %v94_v62 = vpop.permute.xlu0 %93 }
  0x9e   :  { %v96_v63 = vsel %vm230_vm0, %v90_v50, %v94_v62  ;;  %v97_v0 = vsel %vm234_vm1, %v90_v50, %v94_v62  ;;  %v98_v1 = vsel %vm73_vm2, %v90_v50, %v94_v62  ;;  %v99_v2 = vsel %vm74_vm3, %v90_v50, %v94_v62 }
  0x9f   :  { %v100_v3 = vsub.f32 %v75_v56, %v96_v63  ;;  %v101_v4 = vsub.f32 %v76_v57, %v97_v0  ;;  %v102_v5 = vsub.f32 %v77_v58, %v98_v1  ;;  %v103_v7 = vsub.f32 %v78_v59, %v99_v2 }
  0xa1   :  { %v104_v9 = vmul.f32 0.25, %v100_v3  ;;  %v105_v10 = vmul.f32 0.25, %v101_v4  ;;  %v106_v11 = vmul.f32 0.25, %v102_v5  ;;  %v107_v12 = vmul.f32 0.25, %v103_v7 }
  0xa3   :  { %v112_v13 = vcombine.low %v104_v9, %v105_v10  ;;  %v113_v6 = vcombine.low %v106_v11, %v107_v12 }
  0xa5   :  { %v120_v14 = vrot.slane %v112_v13, %v119_v8  ;;  %v127_v15 = vrot.slane %v113_v6, %v119_v8 }
  0xa7   :  { %v128_v16 = vcombine.low %v120_v14, %v127_v15 }
  0xa9   :  { %130 = vst [vmem:[#allocation5] sm:$0xff] %v128_v16 }
  0xaa   :  { %188 = shalt.err (!%p185_p12)
}
  0xab   :  { %s189_s22 = scalar_lea.hbm %s259_s1, 128 }
  0xac   :  { %p190_p13 = scmp.ne.s32.totalorder %s259_s1, %s189_s22  ;;  %p193_p0 = scmp.lt.u32.totalorder %s189_s22, %s259_s1 }
  0xae   :  { %p195_p1 = pnand %p193_p0, %p190_p13 }
  0xb0   :  { %198 = shalt.err (!%p195_p1)
}
  0xb1   :  { %140 = dma.vmem_to_hbm [thread:$0]  %s138_s18, 128, %s259_s1, [#allocation4]  }
  0xb2   :  { %201 = dma.done.wait [#allocation4], 128  }
  0xb3   :  { %202 = vsyncadd [#allocation4], 4294967168 }
  0xb4   :  { %144 = vsyncpa [#allocation3], 1 }
  0xb5   :  { %145 = vsyncpa [#allocation4], 1 }

</bundles_post_ra>
